<compile_context>
chip_gen: v7x
topology: tpu7x:2x2x1
jax: 0.10.0
libtpu: 0.0.40
codegen_flags: <defaults>
</compile_context>

<pallas_src>
import functools
import math

import jax
import jax.numpy as jnp
from jax.experimental import pallas as pl
from jax.experimental.pallas import tpu as pltpu


def make_positional_encoding(d_model: int, max_len: int = 5000) -> jnp.ndarray:
    """Deterministic buffer construction mirroring the PyTorch __init__.

    Returns a 2-D (max_len, d_model) table; the PyTorch buffer's middle
    singleton dim exists only for broadcasting and is handled in the kernel.
    """
    position = jnp.arange(0, max_len, dtype=jnp.float32)[:, None]          # (max_len, 1)
    div_term = jnp.exp(
        jnp.arange(0, d_model, 2, dtype=jnp.float32) * (-math.log(10000.0) / d_model)
    )                                                                      # (d_model//2,)
    angles = position * div_term                                           # (max_len, d_model//2)
    pe = jnp.zeros((max_len, d_model), dtype=jnp.float32)
    pe = pe.at[:, 0::2].set(jnp.sin(angles))
    pe = pe.at[:, 1::2].set(jnp.cos(angles))
    return pe


def _pe_add_kernel(x_ref, pe_ref, o_ref, *, batch: int, d_model: int):
    # x_ref / o_ref: (ts, batch * d_model), pe_ref: (ts, d_model).
    # Broadcast pe over the batch axis with static, contiguous lane slices
    # (full-vreg loads/stores whenever d_model is a multiple of 128).
    pe = pe_ref[...]
    for b in range(batch):
        lo = b * d_model
        o_ref[:, lo:lo + d_model] = x_ref[:, lo:lo + d_model] + pe


# Double-buffered working-set budget (x + out + pe tiles).  Comfortably below
# the default scoped VMEM on v5e (16 MiB) and the explicit 32 MiB limit below.
_VMEM_WORKING_SET_BUDGET = 12 * 1024 * 1024
_VMEM_LIMIT_BYTES = 32 * 1024 * 1024


def _choose_seq_tile(seq_len: int, batch: int, d_model: int, itemsize: int) -> int:
    """Pick the sequence-tile size from a VMEM byte budget."""
    # Double-buffered bytes per sequence row: x block + out block (B*D each)
    # plus one pe row (D).
    bytes_per_row = 2 * (2 * batch + 1) * d_model * itemsize
    ts = max(1, _VMEM_WORKING_SET_BUDGET // bytes_per_row)
    if ts >= seq_len:
        ts = seq_len
        # Prefer >=2 grid steps so both v7x TensorCores get work, but only
        # when the tile can stay a multiple of 8 sublanes.
        if seq_len >= 16:
            half = ((seq_len + 1) // 2 + 7) // 8 * 8
            if half < seq_len:
                ts = half
    else:
        ts = max(8, (ts // 8) * 8)  # keep the sublane dim 8-aligned
    return ts


def positional_encoding_forward(x: jnp.ndarray, pe: jnp.ndarray) -> jnp.ndarray:
    """x: (S, B, D); pe: (max_len, D). Returns x + pe[:S] broadcast over B."""
    S, B, D = x.shape
    max_len = pe.shape[0]
    if S > max_len:
        # PyTorch would raise a shape error; fail loudly instead of reading OOB.
        raise ValueError(f"seq_len {S} exceeds positional-encoding max_len {max_len}")

    pe_s = pe[:S].astype(x.dtype)          # (S, D), same dtype as x (no promo mismatch)
    x2 = x.reshape(S, B * D)               # free reshape -> lane-dense 2-D view

    itemsize = jnp.dtype(x.dtype).itemsize
    ts = _choose_seq_tile(S, B, D, itemsize)
    grid = (pl.cdiv(S, ts),)

    kernel = functools.partial(_pe_add_kernel, batch=B, d_model=D)

    out2 = pl.pallas_call(
        kernel,
        out_shape=jax.ShapeDtypeStruct((S, B * D), x.dtype),
        grid_spec=pltpu.PrefetchScalarGridSpec(
            num_scalar_prefetch=0,
            grid=grid,
            in_specs=[
                pl.BlockSpec((ts, B * D), lambda i: (i, 0)),
                pl.BlockSpec((ts, D), lambda i: (i, 0)),
            ],
            out_specs=pl.BlockSpec((ts, B * D), lambda i: (i, 0)),
        ),
        compiler_params=pltpu.CompilerParams(
            dimension_semantics=("parallel",),
            vmem_limit_bytes=_VMEM_LIMIT_BYTES,
        ),
    )(x2, pe_s)

    return out2.reshape(S, B, D)


if __name__ == "__main__":
    key = jax.random.PRNGKey(0)
    k1, k2 = jax.random.split(key)

    # Small demo shape consistent with the module: (seq_len, batch, d_model).
    seq_len, batch, d_model = 8, 2, 32
    pe = make_positional_encoding(d_model, max_len=64)
    x = jax.random.normal(k1, (seq_len, batch, d_model), dtype=jnp.float32)

    out = jax.block_until_ready(positional_encoding_forward(x, pe))
    ref = x + pe[:seq_len][:, None, :]
    assert out.shape == (seq_len, batch, d_model)
    assert jnp.allclose(out, ref, atol=1e-6), "mismatch vs reference (small shape)"

    # Second shape exercising the multi-step grid and 128-multiple lane blocks.
    seq_len2, batch2, d_model2 = 48, 4, 128
    pe2 = make_positional_encoding(d_model2, max_len=128)
    x2 = jax.random.normal(k2, (seq_len2, batch2, d_model2), dtype=jnp.float32)

    out2 = jax.block_until_ready(positional_encoding_forward(x2, pe2))
    ref2 = x2 + pe2[:seq_len2][:, None, :]
    assert jnp.allclose(out2, ref2, atol=1e-6), "mismatch vs reference (tiled shape)"

    print("KERNEL_OK")
</pallas_src>

<mosaic_0001>
module attributes {stable_mosaic.version = 11 : i64} {
  func.func @_pe_add_kernel(%arg0: i32, %arg1: memref<8x64xf32, #tpu.memory_space<vmem>>, %arg2: memref<8x32xf32, #tpu.memory_space<vmem>>, %arg3: memref<8x64xf32, #tpu.memory_space<vmem>>) attributes {dimension_semantics = [#tpu.dimension_semantics<parallel>], iteration_bounds = array<i64: 1>, scalar_prefetch = 0 : i64, scratch_operands = 0 : i64, tpu.core_type = #tpu.core_type<tc>, window_params = [{transform_indices = @transform_0, window_bounds = array<i64: 8, 64>}, {transform_indices = @transform_1, window_bounds = array<i64: 8, 32>}, {transform_indices = @transform_2, window_bounds = array<i64: 8, 64>}]} {
    %c0 = arith.constant 0 : index
    %c0_0 = arith.constant 0 : index
    %0 = vector.load %arg2[%c0, %c0_0] : memref<8x32xf32, #tpu.memory_space<vmem>>, vector<8x32xf32>
    %c0_1 = arith.constant 0 : index
    %c0_2 = arith.constant 0 : index
    %1 = vector.load %arg1[%c0_1, %c0_2] : memref<8x64xf32, #tpu.memory_space<vmem>>, vector<8x32xf32>
    %2 = arith.addf %1, %0 : vector<8x32xf32>
    %c0_3 = arith.constant 0 : index
    %c0_4 = arith.constant 0 : index
    %3 = vector.load %arg3[%c0_3, %c0_4] : memref<8x64xf32, #tpu.memory_space<vmem>>, vector<8x32xf32>
    tpu.vector_store %arg3[%c0_3, %c0_4], %2 {strides = array<i32>} : memref<8x64xf32, #tpu.memory_space<vmem>>, vector<8x32xf32>,
    %c0_5 = arith.constant 0 : index
    %c32 = arith.constant 32 : index
    %4 = vector.load %arg1[%c0_5, %c32] : memref<8x64xf32, #tpu.memory_space<vmem>>, vector<8x32xf32>
    %5 = arith.addf %4, %0 : vector<8x32xf32>
    %c0_6 = arith.constant 0 : index
    %c32_7 = arith.constant 32 : index
    %6 = vector.load %arg3[%c0_6, %c32_7] : memref<8x64xf32, #tpu.memory_space<vmem>>, vector<8x32xf32>
    tpu.vector_store %arg3[%c0_6, %c32_7], %5 {strides = array<i32>} : memref<8x64xf32, #tpu.memory_space<vmem>>, vector<8x32xf32>,
    return
  }
  func.func @transform_0(%arg0: i32) -> (i32, i32) {
    %c0_i32 = arith.constant 0 : i32
    %c0_i32_0 = arith.constant 0 : i32
    return %arg0, %c0_i32 : i32, i32
  }
  func.func @transform_1(%arg0: i32) -> (i32, i32) {
    %c0_i32 = arith.constant 0 : i32
    %c0_i32_0 = arith.constant 0 : i32
    return %arg0, %c0_i32 : i32, i32
  }
  func.func @transform_2(%arg0: i32) -> (i32, i32) {
    %c0_i32 = arith.constant 0 : i32
    %c0_i32_0 = arith.constant 0 : i32
    return %arg0, %c0_i32 : i32, i32
  }
}

</mosaic_0001>

<bundles_post_ra>
// kernel: tpu_custom_call.1
= control target key start
LH: loop header
LB: loop body
LE: loop exit
PB: predicated region body
PF: predicated region fallthrough
CT: control target
= control target key end

     0   :  { %7 = vsyncpa [#allocation3], 0  ;;  %s196_s0 = inlined_call_operand.hbm [shape: f32[8,64], index: 0, kind: input, shape index: {}]   ;;  %s197_s1 = inlined_call_operand.hbm [shape: f32[8,32], index: 1, kind: input, shape index: {}]   ;;  %s198_s2 = inlined_call_operand.hbm [shape: f32[8,64], index: 2, kind: output, shape index: {}]  }
   0x1   :  { %8 = vsyncpa [#allocation6], 0 }
   0x2   :  { %9 = vsyncpa [#allocation4], 0  ;;  %s141_s9 = smov [#allocation2]   ;;  %s142_s11 = smov [#allocation5]  }
   0x3   :  { %s16_s10 = sshll.u32 %s141_s9, 4  ;;  %s26_s12 = sshll.u32 %s142_s11, 4  ;;  %s17_s10 = int_to_ptr.vmem [resolvable:$true] %s16_s10  ;;  %s27_s12 = int_to_ptr.vmem [resolvable:$true] %s26_s12 }
   0x4   :  { %s69_s15 = scalar_lea.hbm %s196_s0, 128 }
   0x5   :  { %p70_p0 = scmp.ne.s32.totalorder %s196_s0, %s69_s15  ;;  %p73_p1 = scmp.lt.u32.totalorder %s69_s15, %s196_s0 }
   0x7   :  { %p75_p2 = pnand %p73_p1, %p70_p0 }
   0x9   :  { %78 = shalt.err (!%p75_p2)
}
   0xa   :  { %s79_s20 = scalar_lea.vmem %s17_s10, 128  ;;  %p84_p4 = scmp.lt.s32.totalorder %s17_s10, %s17_s10 }
   0xb   :  { %p80_p3 = scmp.ne.s32.totalorder %s17_s10, %s79_s20  ;;  %p85_p5 = scmp.lt.s32.totalorder %s79_s20, %s79_s20 }
   0xd   :  { %p86_p6 = por %p85_p5, %p84_p4 }
   0xf   :  { %p87_p7 = pnand %p86_p6, %p80_p3 }
  0x11   :  { %90 = shalt.err (!%p87_p7)
}
  0x12   :  { %19 = dma.hbm_to_vmem [thread:$0]  %s196_s0, 128, %s17_s10, [#allocation3]  }
  0x13   :  { %s91_s25 = scalar_lea.hbm %s197_s1, 128 }
  0x14   :  { %p92_p8 = scmp.ne.s32.totalorder %s197_s1, %s91_s25  ;;  %p95_p9 = scmp.lt.u32.totalorder %s91_s25, %s197_s1 }
  0x16   :  { %p97_p10 = pnand %p95_p9, %p92_p8 }
  0x18   :  { %100 = shalt.err (!%p97_p10)
}
  0x19   :  { %s101_s30 = scalar_lea.vmem %s27_s12, 128  ;;  %p106_p12 = scmp.lt.s32.totalorder %s27_s12, %s27_s12 }
  0x1a   :  { %p102_p11 = scmp.ne.s32.totalorder %s27_s12, %s101_s30  ;;  %p107_p13 = scmp.lt.s32.totalorder %s101_s30, %s101_s30 }
  0x1c   :  { %p108_p0 = por %p107_p13, %p106_p12 }
  0x1e   :  { %p109_p1 = pnand %p108_p0, %p102_p11 }
  0x20   :  { %112 = shalt.err (!%p109_p1)
}
  0x21   :  { %29 = dma.hbm_to_vmem [thread:$0]  %s197_s1, 128, %s27_s12, [#allocation6]  }
  0x22   :  { %135 = dma.done.wait [#allocation3], 128  }
  0x23   :  { %136 = vsyncadd [#allocation3], 4294967168 }
  0x24   :  { %137 = dma.done.wait [#allocation6], 128  }
  0x25   :  { %138 = vsyncadd [#allocation6], 4294967168  ;;  %v36_v0 = vld [vmem:[#allocation5] sm:$0xff]  ;;  %v37_v1 = vld [vmem:[#allocation2] sm:$0xff]  ;;  %vm39_vm0 = vcmask 261120   ;;  %s143_s4 = smov 32  }
  0x26   :  { %v38_v2 = vadd.f32 %v37_v1, %v36_v0  ;;  %43 = vrot.lane.b32.xlu0 %v36_v0, %s143_s4  ;;  %s144_s5 = smov [#allocation7]   ;;  %vm47_vm1 = vcmask 523520  }
  0x27   :  { %s55_s6 = sshll.u32 %s144_s5, 4  ;;  %s56_s6 = int_to_ptr.vmem [resolvable:$true] %s55_s6 }
  0x28   :  { %40 = vst.msk [vmem:[#allocation7] sm:$0xff] %vm39_vm0, %v38_v2  ;;  %s113_s7 = scalar_lea.vmem %s56_s6, 128  ;;  %p118_p3 = scmp.lt.s32.totalorder %s56_s6, %s56_s6 }
  0x29   :  { %p114_p2 = scmp.ne.s32.totalorder %s56_s6, %s113_s7  ;;  %p119_p4 = scmp.lt.s32.totalorder %s113_s7, %s113_s7 }
  0x2b   :  { %p120_p5 = por %p119_p4, %p118_p3 }
  0x2d   :  { %p121_p6 = pnand %p120_p5, %p114_p2 }
  0x98   :  { %v44_v3 = vpop.permute.xlu0 %43 }
  0x99   :  { %v46_v4 = vadd.f32 %v44_v3, %v37_v1 }
  0x9b   :  { %48 = vst.msk [vmem:[#allocation7] sm:$0xff] %vm47_vm1, %v46_v4 }
  0x9c   :  { %124 = shalt.err (!%p121_p6)
}
  0x9d   :  { %s125_s9 = scalar_lea.hbm %s198_s2, 128 }
  0x9e   :  { %p126_p7 = scmp.ne.s32.totalorder %s198_s2, %s125_s9  ;;  %p129_p8 = scmp.lt.u32.totalorder %s125_s9, %s198_s2 }
  0xa0   :  { %p131_p9 = pnand %p129_p8, %p126_p7 }
  0xa2   :  { %134 = shalt.err (!%p131_p9)
}
  0xa3   :  { %58 = dma.vmem_to_hbm [thread:$0]  %s56_s6, 128, %s198_s2, [#allocation4]  }
  0xa4   :  { %139 = dma.done.wait [#allocation4], 128  }
  0xa5   :  { %140 = vsyncadd [#allocation4], 4294967168 }
  0xa6   :  { %62 = vsyncpa [#allocation3], 1 }
  0xa7   :  { %63 = vsyncpa [#allocation6], 1 }
  0xa8   :  { %64 = vsyncpa [#allocation4], 1 }

</bundles_post_ra>
